<compile_context>
chip_gen: v7x
topology: tpu7x:2x2x1
jax: 0.10.0
libtpu: 0.0.40
codegen_flags: <defaults>
</compile_context>

<pallas_src>
import jax
import jax.numpy as jnp
from jax.experimental import pallas as pl
from jax.experimental.pallas import tpu as pltpu


def _round_up(x, m):
    return ((x + m - 1) // m) * m


def asymmetric_convolution_pallas(x_nchw, w1, w2, b2, ws, *, matmul_dtype=None):
    """x_nchw: (N, C, H, W); w1: (O, C, 3, 1); w2: (O, C, 1, 3); b2: (O,);
    ws: (O, C) 1x1 shortcut weight, or None (identity shortcut, requires C == O).
    matmul_dtype: dtype of MXU operands (default: input dtype); accumulation is always f32."""
    N, C, H, W = x_nchw.shape
    O = w1.shape[0]
    HW = H * W
    O_p = _round_up(O, 8)               # sublane-aligned tap row-blocks in the packed weight
    PADL = _round_up(W, 128)            # left halo sized so the bulk center store is lane-aligned
    if matmul_dtype is None:
        matmul_dtype = x_nchw.dtype
    identity_shortcut = ws is None
    if identity_shortcut:
        assert C == O, "identity shortcut requires in_cha == out_cha"
    n_taps = 5 + (0 if identity_shortcut else 1)

    # ---- wrapper glue: free reshape + tiny weight packing (no transposes, no HBM padding) ----
    x_flat = x_nchw.reshape(N, C, HW)   # contiguous reshape: no data movement

    def pad_rows(m):                    # (O, C) -> (O_p, C)
        return jnp.pad(m, ((0, O_p - O), (0, 0)))

    blocks = [
        pad_rows(w1[:, :, 0, 0]),                    # tap 0: x[h-1, w]
        pad_rows(w1[:, :, 1, 0] + w2[:, :, 0, 1]),   # tap 1: x[h, w] (shared center, pre-summed)
        pad_rows(w1[:, :, 2, 0]),                    # tap 2: x[h+1, w]
        pad_rows(w2[:, :, 0, 0]),                    # tap 3: x[h, w-1]
        pad_rows(w2[:, :, 0, 2]),                    # tap 4: x[h, w+1]
    ]
    if not identity_shortcut:
        blocks.append(pad_rows(ws))                  # tap 5: 1x1 shortcut (added after ReLU)
    wpack = jnp.concatenate(blocks, axis=0).astype(matmul_dtype)     # (n_taps*O_p, C)
    b2_col = jnp.pad(b2, (0, O_p - O)).reshape(O_p, 1).astype(jnp.float32)

    def kernel(x_ref, w_ref, b_ref, o_ref, xp_ref):
        # x_ref:  (1, C, HW)          input dtype, lane-dense along H*W
        # w_ref:  (n_taps*O_p, C)     matmul dtype, tap row-blocks [h-1, c, h+1, w-1, w+1, (sc)]
        # b_ref:  (O_p, 1)            f32 conv2 bias
        # o_ref:  (1, O, HW)          NCHW output block (exact O channels, no padding)
        # xp_ref: (C, PADL + HW + W)  zero-haloed staging scratch
        # Halos are re-zeroed every step (cheap: 2 strips) so the batch axis can be megacore
        # "parallel" on v7x without relying on step 0 running on every core.
        xp_ref[:, :PADL] = jnp.zeros((C, PADL), xp_ref.dtype)
        xp_ref[:, PADL + HW:] = jnp.zeros((C, W), xp_ref.dtype)
        xp_ref[:, PADL:PADL + HW] = x_ref[0]

        wm = w_ref[...]
        col = jax.lax.broadcasted_iota(jnp.int32, (1, HW), 1)
        keep_wm1 = (col % W) != 0            # x[h, w-1] valid (w > 0)
        keep_wp1 = (col % W) != (W - 1)      # x[h, w+1] valid (w < W-1)
        zero = jnp.zeros((), wm.dtype)

        def rhs(off):                        # free shifted view of the haloed staging buffer
            return xp_ref[:, off:off + HW].astype(wm.dtype)

        def tap(i, v):                       # (O_p, C) @ (C, HW) -> (O_p, HW), f32 accumulation
            return jnp.dot(wm[i * O_p:(i + 1) * O_p, :], v,
                           preferred_element_type=jnp.float32)

        conv = (tap(0, rhs(PADL - W))
                + tap(1, rhs(PADL))
                + tap(2, rhs(PADL + W))
                + tap(3, jnp.where(keep_wm1, rhs(PADL - 1), zero))
                + tap(4, jnp.where(keep_wp1, rhs(PADL + 1), zero)))
        y = jnp.maximum(conv + b_ref[...], 0.0)                       # (O_p, HW) f32

        if identity_shortcut:
            # Residual added in full input precision; never routed through the MXU/matmul dtype.
            sc = xp_ref[:, PADL:PADL + HW].astype(jnp.float32)        # (C == O, HW)
            o_ref[0] = (y[:O, :] + sc).astype(o_ref.dtype)
        else:
            sc = tap(5, rhs(PADL))                                    # 1x1 shortcut dot
            o_ref[0] = (y[:O, :] + sc[:O, :]).astype(o_ref.dtype)

    io_sz = jnp.dtype(x_nchw.dtype).itemsize
    mm_sz = jnp.dtype(matmul_dtype).itemsize
    flops = 2 * N * n_taps * O_p * C * HW
    bytes_accessed = N * HW * (C + O) * io_sz + n_taps * O_p * C * mm_sz + O_p * 4

    # VMEM budget: double-buffered I/O blocks + staging scratch + tap operands / f32 partials,
    # clamped to ~80% of physical VMEM (64 MiB on v7x, 128 MiB on v5e/v6e) for Mosaic headroom.
    need = (2 * (C + O) * HW * io_sz
            + 2 * (n_taps * O_p * C * mm_sz + O_p * 4)
            + C * (PADL + HW + W) * io_sz
            + 5 * C * HW * mm_sz + 4 * O_p * HW * 4
            + (4 << 20))
    try:
        vmem_cap = int(getattr(pltpu.get_tpu_info(), "vmem_capacity_bytes", 0) or (64 << 20))
    except Exception:
        vmem_cap = 64 << 20
    vmem_limit = int(min(max(need, 32 << 20), int(0.8 * vmem_cap)))

    out_flat = pl.pallas_call(
        kernel,
        out_shape=jax.ShapeDtypeStruct((N, O, HW), x_nchw.dtype),
        grid=(N,),
        in_specs=[
            pl.BlockSpec((1, C, HW), lambda n: (n, 0, 0)),
            pl.BlockSpec((n_taps * O_p, C), lambda n: (0, 0)),
            pl.BlockSpec((O_p, 1), lambda n: (0, 0)),
        ],
        out_specs=pl.BlockSpec((1, O, HW), lambda n: (n, 0, 0)),
        scratch_shapes=[pltpu.VMEM((C, PADL + HW + W), x_nchw.dtype)],
        compiler_params=pltpu.CompilerParams(
            dimension_semantics=("parallel",),
            vmem_limit_bytes=vmem_limit,
        ),
        cost_estimate=pl.CostEstimate(flops=flops, transcendentals=0,
                                      bytes_accessed=bytes_accessed),
    )(x_flat, wpack, b2_col)

    return out_flat.reshape(N, O, H, W)   # free reshape back to NCHW


def asymmetric_convolution_ref(x, w1, w2, b2, ws):
    """Pure-JAX f32 reference (NCHW, mirrors the intended PyTorch semantics)."""
    dn = ("NCHW", "OIHW", "NCHW")
    y1 = jax.lax.conv_general_dilated(x, w1, (1, 1), ((1, 1), (0, 0)), dimension_numbers=dn)
    y2 = jax.lax.conv_general_dilated(x, w2, (1, 1), ((0, 0), (1, 1)), dimension_numbers=dn)
    y2 = y2 + b2[None, :, None, None]
    if ws is None:
        sc = x
    else:
        sc = jax.lax.conv_general_dilated(x, ws[:, :, None, None], (1, 1), ((0, 0), (0, 0)),
                                          dimension_numbers=dn)
    return jnp.maximum(y1 + y2, 0.0) + sc


if __name__ == "__main__":
    N, C_IN, C_OUT, H, W = 2, 4, 8, 16, 16

    key = jax.random.PRNGKey(0)
    kx, k1, k2, k3, k4 = jax.random.split(key, 5)
    x = jax.random.normal(kx, (N, C_IN, H, W), jnp.float32)
    w1 = jax.random.normal(k1, (C_OUT, C_IN, 3, 1), jnp.float32) * 0.1   # conv1, bias=False
    w2 = jax.random.normal(k2, (C_OUT, C_IN, 1, 3), jnp.float32) * 0.1   # conv2 (with bias)
    b2 = jax.random.normal(k3, (C_OUT,), jnp.float32) * 0.1
    ws = jax.random.normal(k4, (C_OUT, C_IN), jnp.float32) * 0.1         # 1x1 shortcut (in != out)

    ref = jax.block_until_ready(asymmetric_convolution_ref(x, w1, w2, b2, ws))

    # f32 path (default), 1x1-shortcut branch: strict check.
    out_f32 = jax.block_until_ready(asymmetric_convolution_pallas(x, w1, w2, b2, ws))
    err_f32 = float(jnp.max(jnp.abs(out_f32 - ref)))
    if out_f32.shape != (N, C_OUT, H, W) or err_f32 > 2e-3:
        raise RuntimeError(f"f32 path mismatch: shape={out_f32.shape}, max_err={err_f32}")

    # Identity-shortcut branch (in_cha == out_cha): residual added in f32 in the epilogue.
    w1i, w2i, b2i = w1[:C_IN], w2[:C_IN], b2[:C_IN]
    ref_id = jax.block_until_ready(asymmetric_convolution_ref(x, w1i, w2i, b2i, None))
    out_id = jax.block_until_ready(asymmetric_convolution_pallas(x, w1i, w2i, b2i, None))
    err_id = float(jnp.max(jnp.abs(out_id - ref_id)))
    if out_id.shape != (N, C_IN, H, W) or err_id > 2e-3:
        raise RuntimeError(f"identity path mismatch: shape={out_id.shape}, max_err={err_id}")

    # bf16 MXU operands / f32 accumulation path (tolerance covers operand rounding only).
    out_bf16 = jax.block_until_ready(
        asymmetric_convolution_pallas(x, w1, w2, b2, ws, matmul_dtype=jnp.bfloat16))
    err_bf16 = float(jnp.max(jnp.abs(out_bf16 - ref)))
    if out_bf16.shape != (N, C_OUT, H, W) or err_bf16 > 2e-2:
        raise RuntimeError(f"bf16 path mismatch: shape={out_bf16.shape}, max_err={err_bf16}")

    print("KERNEL_OK")
</pallas_src>

<mosaic_0001>
module attributes {stable_mosaic.version = 11 : i64} {
  func.func @kernel(%arg0: i32, %arg1: memref<1x4x256xf32, #tpu.memory_space<vmem>>, %arg2: memref<48x4xf32, #tpu.memory_space<vmem>>, %arg3: memref<8x1xf32, #tpu.memory_space<vmem>>, %arg4: memref<1x8x256xf32, #tpu.memory_space<vmem>>, %arg5: memref<4x400xf32, #tpu.memory_space<vmem>>) attributes {dimension_semantics = [#tpu.dimension_semantics<parallel>], iteration_bounds = array<i64: 2>, scalar_prefetch = 0 : i64, scratch_operands = 1 : i64, tpu.core_type = #tpu.core_type<tc>, window_params = [{transform_indices = @transform_0, window_bounds = array<i64: 1, 4, 256>}, {pipeline_mode = #tpu.pipeline_mode<synchronous>, transform_indices = @transform_1, window_bounds = array<i64: 48, 4>}, {pipeline_mode = #tpu.pipeline_mode<synchronous>, transform_indices = @transform_2, window_bounds = array<i64: 8, 1>}, {transform_indices = @transform_3, window_bounds = array<i64: 1, 8, 256>}]} {
    %cst = arith.constant 0.000000e+00 : f32
    %0 = vector.broadcast %cst : f32 to vector<4x128xf32>
    %c0 = arith.constant 0 : index
    %c0_0 = arith.constant 0 : index
    %1 = vector.load %arg5[%c0, %c0_0] : memref<4x400xf32, #tpu.memory_space<vmem>>, vector<4x128xf32>
    tpu.vector_store %arg5[%c0, %c0_0], %0 {strides = array<i32>} : memref<4x400xf32, #tpu.memory_space<vmem>>, vector<4x128xf32>,
    %cst_1 = arith.constant 0.000000e+00 : f32
    %2 = vector.broadcast %cst_1 : f32 to vector<4x16xf32>
    %c0_2 = arith.constant 0 : index
    %c384 = arith.constant 384 : index
    %3 = vector.load %arg5[%c0_2, %c384] : memref<4x400xf32, #tpu.memory_space<vmem>>, vector<4x16xf32>
    tpu.vector_store %arg5[%c0_2, %c384], %2 {strides = array<i32>} : memref<4x400xf32, #tpu.memory_space<vmem>>, vector<4x16xf32>,
    %c0_3 = arith.constant 0 : index
    %c0_4 = arith.constant 0 : index
    %c0_5 = arith.constant 0 : index
    %4 = vector.load %arg1[%c0_3, %c0_4, %c0_5] : memref<1x4x256xf32, #tpu.memory_space<vmem>>, vector<1x4x256xf32>
    %5 = vector.shape_cast %4 : vector<1x4x256xf32> to vector<4x256xf32>
    %c0_6 = arith.constant 0 : index
    %c128 = arith.constant 128 : index
    %6 = vector.load %arg5[%c0_6, %c128] : memref<4x400xf32, #tpu.memory_space<vmem>>, vector<4x256xf32>
    tpu.vector_store %arg5[%c0_6, %c128], %5 {strides = array<i32>} : memref<4x400xf32, #tpu.memory_space<vmem>>, vector<4x256xf32>,
    %c0_7 = arith.constant 0 : index
    %c0_8 = arith.constant 0 : index
    %7 = vector.load %arg2[%c0_7, %c0_8] : memref<48x4xf32, #tpu.memory_space<vmem>>, vector<48x4xf32>
    %8 = tpu.iota {dimensions = array<i32: 1>} : vector<1x256xi32>
    %c16_i32 = arith.constant 16 : i32
    %c0_i32 = arith.constant 0 : i32
    %9 = arith.cmpi eq, %c16_i32, %c0_i32 : i32
    %c1_i32 = arith.constant 1 : i32
    %10 = arith.select %9, %c1_i32, %c16_i32 : i32
    %11 = vector.broadcast %10 : i32 to vector<1x256xi32>
    %12 = arith.remsi %8, %11 : vector<1x256xi32>
    %c0_i32_9 = arith.constant 0 : i32
    %13 = vector.broadcast %c0_i32_9 : i32 to vector<1x256xi32>
    %14 = arith.cmpi ne, %12, %13 : vector<1x256xi32>
    %c0_i32_10 = arith.constant 0 : i32
    %15 = vector.broadcast %c0_i32_10 : i32 to vector<1x256xi32>
    %16 = arith.cmpi slt, %12, %15 : vector<1x256xi32>
    %c0_i32_11 = arith.constant 0 : i32
    %17 = arith.cmpi slt, %10, %c0_i32_11 : i32
    %18 = vector.broadcast %17 : i1 to vector<1x256xi1>
    %19 = vector.broadcast %18 : vector<1x256xi1> to vector<1x256xi1>
    %20 = arith.xori %16, %19 : vector<1x256xi1>
    %21 = arith.andi %20, %14 : vector<1x256xi1>
    %22 = vector.broadcast %10 : i32 to vector<1x256xi32>
    %23 = arith.addi %12, %22 : vector<1x256xi32>
    %24 = arith.select %21, %23, %12 : vector<1x256xi1>, vector<1x256xi32>
    %c0_i32_12 = arith.constant 0 : i32
    %25 = vector.broadcast %c0_i32_12 : i32 to vector<1x256xi32>
    %26 = arith.cmpi ne, %24, %25 : vector<1x256xi32>
    %c16_i32_13 = arith.constant 16 : i32
    %c0_i32_14 = arith.constant 0 : i32
    %27 = arith.cmpi eq, %c16_i32_13, %c0_i32_14 : i32
    %c1_i32_15 = arith.constant 1 : i32
    %28 = arith.select %27, %c1_i32_15, %c16_i32_13 : i32
    %29 = vector.broadcast %28 : i32 to vector<1x256xi32>
    %30 = arith.remsi %8, %29 : vector<1x256xi32>
    %c0_i32_16 = arith.constant 0 : i32
    %31 = vector.broadcast %c0_i32_16 : i32 to vector<1x256xi32>
    %32 = arith.cmpi ne, %30, %31 : vector<1x256xi32>
    %c0_i32_17 = arith.constant 0 : i32
    %33 = vector.broadcast %c0_i32_17 : i32 to vector<1x256xi32>
    %34 = arith.cmpi slt, %30, %33 : vector<1x256xi32>
    %c0_i32_18 = arith.constant 0 : i32
    %35 = arith.cmpi slt, %28, %c0_i32_18 : i32
    %36 = vector.broadcast %35 : i1 to vector<1x256xi1>
    %37 = vector.broadcast %36 : vector<1x256xi1> to vector<1x256xi1>
    %38 = arith.xori %34, %37 : vector<1x256xi1>
    %39 = arith.andi %38, %32 : vector<1x256xi1>
    %40 = vector.broadcast %28 : i32 to vector<1x256xi32>
    %41 = arith.addi %30, %40 : vector<1x256xi32>
    %42 = arith.select %39, %41, %30 : vector<1x256xi1>, vector<1x256xi32>
    %c15_i32 = arith.constant 15 : i32
    %43 = vector.broadcast %c15_i32 : i32 to vector<1x256xi32>
    %44 = arith.cmpi ne, %42, %43 : vector<1x256xi32>
    %c0_19 = arith.constant 0 : index
    %c112 = arith.constant 112 : index
    %45 = vector.load %arg5[%c0_19, %c112] : memref<4x400xf32, #tpu.memory_space<vmem>>, vector<4x256xf32>
    %46 = vector.extract_strided_slice %7 {offsets = [0, 0], sizes = [8, 4], strides = [1, 1]} : vector<48x4xf32> to vector<8x4xf32>
    %cst_20 = arith.constant dense<0.000000e+00> : vector<8x256xf32>
    %47 = tpu.matmul %46, %45, %cst_20 {dimension_numbers = #tpu.dot_dimension_numbers<[1], [0], [0], [1], [0, 0, 1, 1], [], []>} : vector<8x4xf32>, vector<4x256xf32>, vector<8x256xf32> -> vector<8x256xf32>
    %c0_21 = arith.constant 0 : index
    %c128_22 = arith.constant 128 : index
    %48 = vector.load %arg5[%c0_21, %c128_22] : memref<4x400xf32, #tpu.memory_space<vmem>>, vector<4x256xf32>
    %49 = vector.extract_strided_slice %7 {offsets = [8, 0], sizes = [8, 4], strides = [1, 1]} : vector<48x4xf32> to vector<8x4xf32>
    %cst_23 = arith.constant dense<0.000000e+00> : vector<8x256xf32>
    %50 = tpu.matmul %49, %48, %cst_23 {dimension_numbers = #tpu.dot_dimension_numbers<[1], [0], [0], [1], [0, 0, 1, 1], [], []>} : vector<8x4xf32>, vector<4x256xf32>, vector<8x256xf32> -> vector<8x256xf32>
    %51 = arith.addf %47, %50 : vector<8x256xf32>
    %c0_24 = arith.constant 0 : index
    %c144 = arith.constant 144 : index
    %52 = vector.load %arg5[%c0_24, %c144] : memref<4x400xf32, #tpu.memory_space<vmem>>, vector<4x256xf32>
    %53 = vector.extract_strided_slice %7 {offsets = [16, 0], sizes = [8, 4], strides = [1, 1]} : vector<48x4xf32> to vector<8x4xf32>
    %cst_25 = arith.constant dense<0.000000e+00> : vector<8x256xf32>
    %54 = tpu.matmul %53, %52, %cst_25 {dimension_numbers = #tpu.dot_dimension_numbers<[1], [0], [0], [1], [0, 0, 1, 1], [], []>} : vector<8x4xf32>, vector<4x256xf32>, vector<8x256xf32> -> vector<8x256xf32>
    %55 = arith.addf %51, %54 : vector<8x256xf32>
    %c0_26 = arith.constant 0 : index
    %c127 = arith.constant 127 : index
    %56 = vector.load %arg5[%c0_26, %c127] : memref<4x400xf32, #tpu.memory_space<vmem>>, vector<4x256xf32>
    %cst_27 = arith.constant 0.000000e+00 : f32
    %57 = vector.shape_cast %26 : vector<1x256xi1> to vector<1x256xi1>
    %58 = vector.broadcast %57 : vector<1x256xi1> to vector<4x256xi1>
    %59 = vector.broadcast %cst_27 : f32 to vector<4x256xf32>
    %60 = arith.select %58, %56, %59 : vector<4x256xi1>, vector<4x256xf32>
    %61 = vector.extract_strided_slice %7 {offsets = [24, 0], sizes = [8, 4], strides = [1, 1]} : vector<48x4xf32> to vector<8x4xf32>
    %cst_28 = arith.constant dense<0.000000e+00> : vector<8x256xf32>
    %62 = tpu.matmul %61, %60, %cst_28 {dimension_numbers = #tpu.dot_dimension_numbers<[1], [0], [0], [1], [0, 0, 1, 1], [], []>} : vector<8x4xf32>, vector<4x256xf32>, vector<8x256xf32> -> vector<8x256xf32>
    %63 = arith.addf %55, %62 : vector<8x256xf32>
    %c0_29 = arith.constant 0 : index
    %c129 = arith.constant 129 : index
    %64 = vector.load %arg5[%c0_29, %c129] : memref<4x400xf32, #tpu.memory_space<vmem>>, vector<4x256xf32>
    %cst_30 = arith.constant 0.000000e+00 : f32
    %65 = vector.shape_cast %44 : vector<1x256xi1> to vector<1x256xi1>
    %66 = vector.broadcast %65 : vector<1x256xi1> to vector<4x256xi1>
    %67 = vector.broadcast %cst_30 : f32 to vector<4x256xf32>
    %68 = arith.select %66, %64, %67 : vector<4x256xi1>, vector<4x256xf32>
    %69 = vector.extract_strided_slice %7 {offsets = [32, 0], sizes = [8, 4], strides = [1, 1]} : vector<48x4xf32> to vector<8x4xf32>
    %cst_31 = arith.constant dense<0.000000e+00> : vector<8x256xf32>
    %70 = tpu.matmul %69, %68, %cst_31 {dimension_numbers = #tpu.dot_dimension_numbers<[1], [0], [0], [1], [0, 0, 1, 1], [], []>} : vector<8x4xf32>, vector<4x256xf32>, vector<8x256xf32> -> vector<8x256xf32>
    %71 = arith.addf %63, %70 : vector<8x256xf32>
    %c0_32 = arith.constant 0 : index
    %c0_33 = arith.constant 0 : index
    %72 = vector.load %arg3[%c0_32, %c0_33] : memref<8x1xf32, #tpu.memory_space<vmem>>, vector<8x1xf32>
    %73 = vector.broadcast %72 : vector<8x1xf32> to vector<8x256xf32>
    %74 = arith.addf %71, %73 : vector<8x256xf32>
    %cst_34 = arith.constant 0.000000e+00 : f32
    %75 = vector.broadcast %cst_34 : f32 to vector<8x256xf32>
    %76 = arith.maximumf %74, %75 : vector<8x256xf32>
    %c0_35 = arith.constant 0 : index
    %c128_36 = arith.constant 128 : index
    %77 = vector.load %arg5[%c0_35, %c128_36] : memref<4x400xf32, #tpu.memory_space<vmem>>, vector<4x256xf32>
    %78 = vector.extract_strided_slice %7 {offsets = [40, 0], sizes = [8, 4], strides = [1, 1]} : vector<48x4xf32> to vector<8x4xf32>
    %cst_37 = arith.constant dense<0.000000e+00> : vector<8x256xf32>
    %79 = tpu.matmul %78, %77, %cst_37 {dimension_numbers = #tpu.dot_dimension_numbers<[1], [0], [0], [1], [0, 0, 1, 1], [], []>} : vector<8x4xf32>, vector<4x256xf32>, vector<8x256xf32> -> vector<8x256xf32>
    %80 = arith.addf %76, %79 : vector<8x256xf32>
    %c0_38 = arith.constant 0 : index
    %c0_39 = arith.constant 0 : index
    %c0_40 = arith.constant 0 : index
    %81 = vector.load %arg4[%c0_38, %c0_39, %c0_40] : memref<1x8x256xf32, #tpu.memory_space<vmem>>, vector<1x8x256xf32>
    %82 = vector.shape_cast %81 : vector<1x8x256xf32> to vector<8x256xf32>
    %83 = vector.shape_cast %80 : vector<8x256xf32> to vector<1x8x256xf32>
    tpu.vector_store %arg4[%c0_38, %c0_39, %c0_40], %83 {strides = array<i32>} : memref<1x8x256xf32, #tpu.memory_space<vmem>>, vector<1x8x256xf32>,
    return
  }
  func.func @transform_0(%arg0: i32) -> (i32, i32, i32) {
    %c0_i32 = arith.constant 0 : i32
    %c0_i32_0 = arith.constant 0 : i32
    %c0_i32_1 = arith.constant 0 : i32
    return %arg0, %c0_i32, %c0_i32_0 : i32, i32, i32
  }
  func.func @transform_1(%arg0: i32) -> (i32, i32) {
    %c0_i32 = arith.constant 0 : i32
    %c0_i32_0 = arith.constant 0 : i32
    %c0_i32_1 = arith.constant 0 : i32
    return %c0_i32, %c0_i32_0 : i32, i32
  }
  func.func @transform_2(%arg0: i32) -> (i32, i32) {
    %c0_i32 = arith.constant 0 : i32
    %c0_i32_0 = arith.constant 0 : i32
    %c0_i32_1 = arith.constant 0 : i32
    return %c0_i32, %c0_i32_0 : i32, i32
  }
  func.func @transform_3(%arg0: i32) -> (i32, i32, i32) {
    %c0_i32 = arith.constant 0 : i32
    %c0_i32_0 = arith.constant 0 : i32
    %c0_i32_1 = arith.constant 0 : i32
    return %arg0, %c0_i32, %c0_i32_0 : i32, i32, i32
  }
}

</mosaic_0001>

<bundles_post_ra>
// kernel: tpu_custom_call.1
= control target key start
LH: loop header
LB: loop body
LE: loop exit
PB: predicated region body
PF: predicated region fallthrough
CT: control target
= control target key end

     0   :  { %8 = vsyncpa [#allocation4], 0  ;;  %s1193_s0 = inlined_call_operand.vmem [shape: f32[2,4,256], index: 0, kind: input, shape index: {}]   ;;  %s1194_s1 = inlined_call_operand.vmem [shape: f32[48,4], index: 1, kind: input, shape index: {}]   ;;  %s1195_s2 = inlined_call_operand.vmem [shape: f32[8,1], index: 2, kind: input, shape index: {}]   ;;  %s1196_s3 = inlined_call_operand.hbm [shape: f32[2,8,256], index: 3, kind: output, shape index: {}]  }
   0x1   :  { %10 = vsyncpa [#allocation4 + $0x1], 0  ;;  %s1029_s12 = smov 0   ;;  %s1031_s13 = smov 0  }
   0x2   :  { %s1033_s14 = smov 0   ;;  %s1035_s15 = smov 0  }
   0x3 LB: > { %s1050_s16 = sadd.s32 4294967295, %s1000_s15   ;;  %s850_s17 = sadd.s32 4294967294, %s1000_s15   ;;  %s1000_s15 = sphi %s1035_s15, %s1202_s15   ;;  %s996_s14 = sphi %s1033_s14, %s1201_s14   ;;  %s992_s13 = sphi %s1031_s13, %s1200_s13   ;;  %s988_s12 = sphi %s1029_s12, %s1199_s12  }
   0x4   : > { %s1054_s18 = sadd.s32 1, %s1000_s15   ;;  %s91_s19 = sadd.s32 1, %s996_s14 }
   0x5   : > { %s88_s20 = ssub.s32 %s1000_s15, %s1054_s18  ;;  %p101_p0 = scmp.ne.s32.totalorder %s996_s14, %s992_s13 }
   0x6   : > { %p89_p1 = scmp.eq.s32.totalorder %s88_s20, 0  ;;  %p102_p2 = scmp.eq.s32.totalorder %s1050_s16, 1 }
   0x7   : > { %p107_p3 = scmp.ne.s32.totalorder %s992_s13, %s988_s12  ;;  %p108_p4 = scmp.eq.s32.totalorder %s850_s17, 1 }
   0x8   : > { %s1065_s21 = scalar_select %p89_p1, %s996_s14, %s91_s19  }
   0x9   : > { %p1067_p5 = por %p102_p2, %p101_p0  ;;  %p1071_p6 = por %p108_p4, %p107_p3 }
   0xa   : > { %p853_p7 = scmp.ge.s32.totalorder %s1000_s15, 1  ;;  %p140_p8 = scmp.lt.s32.totalorder %s1000_s15, 3 }
   0xc   : > { %p141_p9 = pnand %p853_p7, %p140_p8 }
   0xd   : > { %vm170_vm0 = vcmask (!%p141_p9), 125952   ;;  %p164_p10 = scmp.lt.s32.totalorder (!%p141_p9), %s1050_s16, 1  ;;  %v1002_v0 = vmov (!%p141_p9), 0.0   ;;  %s1003_s29 = smov (!%p141_p9), 112   ;;  %vm220_vm1 = vcmask (!%p141_p9), 1043456   ;;  %vm216_vm2 = vcmask (!%p141_p9), 31744  }
   0xe   : > { %144 = sbr.rel (%p141_p9) target bundleno = 402 (0x192), region = 32  ;;  %171 = vst.msk [vmem:[#allocation2 + $0xc] sm:$0xf] (!%p141_p9), %vm170_vm0, %v1002_v0  ;;  %169 = vst [vmem:[#allocation2] sm:$0xf] (!%p141_p9), %v1002_v0  ;;  %471 = vmatprep.mubr.f32.mxu0 (!%p141_p9), %v1002_v0  ;;  %289 = vmatprep.mubr.f32.mxu1 (!%p141_p9), %v1002_v0  ;;  %v175_v4 = vld [vmem:[%s1194_s1 + $0x8] sm:$0xff] (!%p141_p9)  ;;  %v180_v12 = vlaneseq (!%p141_p9) }
   0xf   : > { %s1004_s5 = smov (!%p141_p9), 1   ;;  %s1005_s6 = smov (!%p141_p9), 127   ;;  %v1007_v10 = vmov (!%p141_p9), 0   ;;  %v688_v11 = vld [vmem:[%s1195_s2] sm:$0xff] (!%p141_p9)  ;;  %vm397_vm3 = vcmask (!%p141_p9), 916480   ;;  %v176_v20 = vld [vmem:[%s1194_s1 + $0x10] sm:$0xff] (!%p141_p9) }
  0x10   : > { %s1006_s7 = smov (!%p141_p9), 16   ;;  %935 = vset.pattern.permute.xlu0 (!%p141_p9), %v1007_v10  ;;  %v181_v13 = vand.u32 (!%p141_p9), 127, %v180_v12  ;;  %vm495_vm4 = vcmask (!%p141_p9), 7168   ;;  %vm599_vm7 = vcmask (!%p141_p9), 1039360   ;;  %v177_v31 = vld [vmem:[%s1194_s1 + $0x18] sm:$0xff] (!%p141_p9)  ;;  %vm305_vm9 = vcmask (!%p141_p9), 130048  }
  0x11   : > { %v178_v40 = vld [vmem:[%s1194_s1 + $0x20] sm:$0xff] (!%p141_p9)  ;;  %v179_v45 = vld [vmem:[%s1194_s1 + $0x28] sm:$0xff] (!%p141_p9)  ;;  %s881_s4 = sshll.u32 (!%p141_p9), %s1050_s16, 8 }
  0x12   : > { %v182_v16 = vadd.s32 (!%p141_p9), 128, %v181_v13  ;;  %v187_v21 = vand.u32 (!%p141_p9), 15, %v181_v13  ;;  %v174_v43 = vld [vmem:[%s1194_s1] sm:$0xff] (!%p141_p9)  ;;  %s1151_s9 = scalar_lea.hbm (!%p141_p9), %s1196_s3, %s881_s4 }
  0x14   : > { %v194_v22 = vand.u32 (!%p141_p9), 15, %v182_v16  ;;  %vm207_vm5 = vcmp.ne.s32.totalorder (!%p141_p9), %v187_v21, 0  ;;  %vm209_vm10 = vcmp.ne.s32.totalorder (!%p141_p9), %v187_v21, 15 }
  0x15   : > { %s165_s24 = scalar_select %p164_p10, %s1050_s16, 1  ;;  %v387_v3 = vld [vmem:[#allocation2 + $0xc] sm:$0xf] }
  0x16   : > { %395 = vrot.lane.b32.xlu0 %v387_v3, %s1003_s29  ;;  %v585_v8 = vld [vmem:[#allocation2 + $0xc] sm:$0xf]  ;;  %vm208_vm6 = vcmp.ne.s32.totalorder %v194_v22, 0  ;;  %vm210_vm8 = vcmp.ne.s32.totalorder %v194_v22, 15  ;;  %s1008_s16 = smov [#allocation3]  }
  0x17   : > { %s880_s25 = sshll.u32 %s165_s24, 3  ;;  %s942_s17 = sshll.u32 %s1008_s16, 4  ;;  %s943_s17 = int_to_ptr.vmem [resolvable:$false] %s942_s17 }
  0x18   : > { %s168_s28 = scalar_lea.vmem %s1193_s0, %s880_s25  ;;  %s944_s19 = scalar_lea.vmem %s943_s17, 512 }
  0x19   : > { %v1086_v1 = vld [vmem:[%s168_s28] sm:$0xff] }
  0x1a   : > { %173 = vst [vmem:[#allocation2 + $0x4] sm:$0xff] %v1086_v1  ;;  %391 = vrot.lane.b32.xlu1 %v1086_v1, %s1003_s29  ;;  %v1092_v2 = vcombine.high %v1086_v1, %v1086_v1 }
  0x1c   : > { %857 = vmatprep.subr.msk.mxu1 %vm220_vm1, %v1092_v2  ;;  %393 = vrot.lane.b32.xlu0 %v1092_v2, %s1003_s29  ;;  %s161_s29 = sand.u32 1, %s992_s13  }
  0x1d   : > { %858 = vmatpush1.msk.msra.mxu1 %vm220_vm1, %v1086_v1  ;;  %s854_s30 = sshll.u32 %s161_s29, 4  ;;  %s777_s10 = scalar_lea.sflag [#allocation4], %s161_s29 }
  0x1e   : > { %859 = vmatmul.mubr.msk.f32.vlgmr.msra.gmra.mrb[0].mxu1 %vm216_vm2, %v175_v4 }
  0x1f   : > { %379 = vmatprep.mubr.f32.mxu1 %v1002_v0 }
  0x21   : > { %v480_v5 = vld [vmem:[#allocation2] sm:$0xff]  ;;  %v481_v6 = vld [vmem:[#allocation2 + $0x8] sm:$0xf] }
  0x22   : > { %v488_v7 = vcombine.high %v480_v5, %v480_v5  ;;  %489 = vrot.lane.b32.xlu1 %v480_v5, %s1004_s5  ;;  %493 = vrot.lane.b32.xlu0 %v481_v6, %s1004_s5  ;;  %v212_v9 = vld [vmem:[#allocation2 + $0x8] sm:$0xf] }
  0x26   : > { %491 = vrot.lane.b32.xlu1 %v488_v7, %s1004_s5  ;;  %595 = vrot.lane.b32.xlu0 %v1092_v2, %s1005_s6  ;;  %s163_s5 = scalar_lea.vmem [#allocation3], %s854_s30 }
  0x2a   : > { %597 = vrot.lane.b32.xlu1 %v585_v8, %s1005_s6  ;;  %301 = vrot.lane.b32.xlu0 %v488_v7, %s1006_s7 }
  0x2e   : > { %303 = vrot.lane.b32.xlu1 %v212_v9, %s1006_s7  ;;  %593 = vrot.lane.b32.xlu0 %v1086_v1, %s1005_s6  ;;  %s791_s6 = sshll.u32 %s163_s5, 4  ;;  %s1153_s6 = int_to_ptr.vmem [resolvable:$true] %s791_s6 }
  0x2f   : > { %s938_s11 = scalar_lea.vmem %s1153_s6, 256  ;;  %p945_p0 = scmp.lt.s32.totalorder %s1153_s6, %s943_s17 }
  0x30   : > { %p939_p11 = scmp.ne.s32.totalorder %s1153_s6, %s938_s11  ;;  %p946_p1 = scmp.lt.s32.totalorder %s944_s19, %s938_s11 }
  0x32   : > { %299 = vrot.lane.b32.xlu1 %v480_v5, %s1006_s7  ;;  %691 = vperm.xlu0 %935, %v688_v11   ;;  %p940_p12 = pnand %p939_p11, %p1067_p5  ;;  %p947_p2 = por %p946_p1, %p945_p0 }
  0x34   : > { %p941_p13 = pneg %p940_p12 }
  0x36   : > { %p948_p3 = pnand %p947_p2, %p941_p13 }
  0x88   : > { %v396_v14 = vpop.permute.xlu0 %395 }
  0x8c   : > { %v392_v15 = vpop.permute.xlu1 %391 }
  0x8e   : > { %v394_v17 = vpop.permute.xlu0 %393 }
  0x8f   : > { %v399_v18 = vsel %vm397_vm3, %v394_v17, %v396_v14  ;;  %v398_v19 = vsel %vm397_vm3, %v392_v15, %v394_v17 }
  0x90   : > { %863 = vmatprep.subr.msk.mxu0 %vm220_vm1, %v399_v18 }
  0x91   : > { %864 = vmatpush1.msk.msra.mxu0 %vm220_vm1, %v398_v19 }
  0x92   : > { %865 = vmatmul.mubr.msk.f32.vlgmr.msra.gmra.mrb[0].mxu0 %vm216_vm2, %v176_v20 }
  0x93   : > { %575 = vmatprep.mubr.f32.mxu0 %v1002_v0 }
  0x94   : > { %v490_v23 = vpop.permute.xlu1 %489  ;;  %v494_v24 = vpop.permute.xlu0 %493 }
  0x98   : > { %v492_v25 = vpop.permute.xlu1 %491  ;;  %v596_v30 = vpop.permute.xlu0 %595 }
  0x99   : > { %v496_v26 = vsel %vm495_vm4, %v490_v23, %v492_v25  ;;  %v497_v27 = vsel %vm495_vm4, %v492_v25, %v494_v24 }
  0x9a   : > { %v500_v28 = vsel %vm207_vm5, %v496_v26, 0.0  ;;  %v501_v29 = vsel %vm208_vm6, %v497_v27, 0.0 }
  0x9b   : > { %866 = vmatprep.subr.msk.mxu0 %vm220_vm1, %v501_v29 }
  0x9c   : > { %v598_v32 = vpop.permute.xlu1 %597  ;;  %867 = vmatpush1.msk.msra.mxu0 %vm220_vm1, %v500_v28  ;;  %v302_v35 = vpop.permute.xlu0 %301 }
  0x9d   : > { %v601_v33 = vsel %vm599_vm7, %v596_v30, %v598_v32  ;;  %868 = vmatmul.mubr.msk.f32.vlgmr.msra.gmra.mrb[0].mxu0 %vm216_vm2, %v177_v31 }
  0x9e   : > { %v605_v34 = vsel %vm210_vm8, %v601_v33, 0.0  ;;  %679 = vmatprep.mubr.f32.mxu0 %v1002_v0 }
  0x9f   : > { %869 = vmatprep.subr.msk.mxu0 %vm220_vm1, %v605_v34 }
  0xa0   : > { %v304_v36 = vpop.permute.xlu1 %303  ;;  %v594_v38 = vpop.permute.xlu0 %593 }
  0xa1   : > { %v307_v37 = vsel %vm305_vm9, %v302_v35, %v304_v36  ;;  %v600_v39 = vsel %vm599_vm7, %v594_v38, %v596_v30 }
  0xa2   : > { %860 = vmatprep.subr.msk.mxu1 %vm220_vm1, %v307_v37  ;;  %v604_v41 = vsel %vm209_vm10, %v600_v39, 0.0 }
  0xa3   : > { %870 = vmatpush1.msk.msra.mxu0 %vm220_vm1, %v604_v41 }
  0xa4   : > { %v300_v42 = vpop.permute.xlu1 %299 }
  0xa5   : > { %v306_v44 = vsel %vm305_vm9, %v300_v42, %v302_v35  ;;  %871 = vmatmul.mubr.msk.f32.vlgmr.msra.gmra.mrb[0].mxu0 %vm216_vm2, %v178_v40 }
  0xa6   : > { %861 = vmatpush1.msk.msra.mxu1 %vm220_vm1, %v306_v44 }
  0xa7   : > { %862 = vmatmul.mubr.msk.f32.vlgmr.msra.gmra.mrb[0].mxu1 %vm216_vm2, %v174_v43  ;;  %872 = vmatprep.subr.msk.mxu1 %vm220_vm1, %v1092_v2 }
  0xa8   : > { %873 = vmatpush1.msk.msra.mxu1 %vm220_vm1, %v1086_v1  ;;  %765 = vmatprep.mubr.f32.mxu1 %v1002_v0 }
  0xab   : > { %874 = vmatmul.mubr.msk.f32.vlgmr.msra.gmra.mrb[2].mxu1 %vm216_vm2, %v179_v45 }
  0xb1   : > { %v692_v47 = vpop.permute.xlu0 %691 }
 0x178   : > { %v681_v46 = vpop.f32.mrb[0].mxu0 }
 0x179   : > { %v683_v49 = vpop.f32.mrb[1].mxu0 }
 0x17a   : > { %v381_v48 = vpop.f32.mrb[0].mxu1 }
 0x17b   : > { %v882_v50 = vadd.f32 %v681_v46, %v381_v48  ;;  %v383_v51 = vpop.f32.mrb[1].mxu1 }
 0x17c   : > { %v883_v52 = vadd.f32 %v683_v49, %v383_v51 }
 0x17d   : > { %v694_v53 = vadd.f32 %v882_v50, %v692_v47 }
 0x17e   : > { %v695_v54 = vadd.f32 %v883_v52, %v692_v47  ;;  %v767_v55 = vpop.f32.mrb[2].mxu1 }
 0x17f   : > { %v696_v56 = vmax.f32 %v694_v53, 0.0  ;;  %v769_v57 = vpop.f32.mrb[3].mxu1 }
 0x180   : > { %v697_v58 = vmax.f32 %v695_v54, 0.0 }
 0x181   : > { %v772_v59 = vadd.f32 %v767_v55, %v696_v56 }
 0x182   : > { %v773_v60 = vadd.f32 %v769_v57, %v697_v58 }
 0x183   : > { %774 = vst [vmem:[%s163_s5] sm:$0xff] %v772_v59 }
 0x184   : > { %775 = vst [vmem:[%s163_s5 + $0x8] sm:$0xff] %v773_v60 }
 0x185   : > { %951 = shalt.err (!%p948_p3)
}
 0x186   : > { %s952_s20 = scalar_lea.hbm %s1151_s9, 256  ;;  %s956_s26 = scalar_lea.hbm %s1196_s3, 512 }
 0x187   : > { %p953_p4 = scmp.ne.s32.totalorder %s1151_s9, %s952_s20  ;;  %p957_p9 = scmp.lt.u32.totalorder %s1151_s9, %s1196_s3 }
 0x188   : > { %p958_p10 = scmp.lt.u32.totalorder %s956_s26, %s952_s20  ;;  %p960_p12 = scmp.lt.u32.totalorder %s952_s20, %s1151_s9 }
 0x189   : > { %p954_p7 = pnand %p953_p4, %p1067_p5 }
 0x18a   : > { %p959_p11 = por %p958_p10, %p957_p9 }
 0x18b   : > { %p955_p8 = pneg %p954_p7 }
 0x18c   : > { %p961_p13 = por %p960_p12, %p959_p11 }
 0x18e   : > { %p962_p0 = pnand %p961_p13, %p955_p8 }
 0x190   : > { %965 = shalt.err (!%p962_p0)
}
 0x191   : > { %890 = dma.vmem_to_hbm [thread:$0]  (%p1067_p5), %s1153_s6, 256, %s1151_s9, %s777_s10  }
 0x192 PF: > { %p896_p1 = scmp.ge.s32.totalorder %s1000_s15, 2  ;;  %s803_s29 = sand.u32 1, %s988_s12  }
 0x193   : > { %s804_s30 = scalar_lea.sflag [#allocation4], %s803_s29 }
 0x194   : > { %p893_p2 = pnand %p896_p1, %p1071_p6 }
 0x196   : > { %983 = dma.done.wait (!%p893_p2), %s804_s30, 256  }
 0x197   : > { %985 = vsyncadd (!%p893_p2), %s804_s30, 4294967040  ;;  %p13_p3 = scmp.ge.s32.totalorder %s1054_s18, 4   ;;  %s1199_s12 = smov %s992_s13 }
 0x198   : > { %s1200_s13 = smov %s996_s14  ;;  %s1201_s14 = smov %s1065_s21 }
 0x199   : > { %s1202_s15 = smov %s1054_s18  ;;  %15 = sbr.rel (!%p13_p3) target bundleno = 3 (0x3), region = 67 }
 0x1a0   :  { %809 = vsyncpa [#allocation4], 1 }
 0x1a1   :  { %811 = vsyncpa [#allocation4 + $0x1], 1 }

</bundles_post_ra>
